<compile_context>
chip_gen: v7x
topology: tpu7x:2x2x1
jax: 0.10.0
libtpu: 0.0.40
codegen_flags: <defaults>
</compile_context>

<pallas_src>
import jax
import jax.numpy as jnp
from jax.experimental import pallas as pl
from jax.experimental.pallas import tpu as pltpu


# ---------------------------------------------------------------------------
# helpers
# ---------------------------------------------------------------------------
def _round_up(x, m):
    return (x + m - 1) // m * m


def _pad_lanes(n):
    """Pad a lane (last-dim) size to a tileable multiple (128 small, 512 big)."""
    return _round_up(n, 128) if n < 512 else _round_up(n, 512)


def _pad_rows(m):
    """Pad a row (sublane / M) size to a tileable multiple (8 small, 256 big)."""
    return _round_up(m, 8) if m < 256 else _round_up(m, 256)


# ---------------------------------------------------------------------------
# kernel 1 & 3: tiled matmul + bias   (M, K) @ (K, N) + b -> (M, N)
# ---------------------------------------------------------------------------
def _matmul_bias_kernel(x_ref, w_ref, b_ref, o_ref, acc_ref):
    @pl.when(pl.program_id(2) == 0)
    def _():
        acc_ref[...] = jnp.zeros_like(acc_ref)

    acc_ref[...] += jnp.dot(x_ref[...], w_ref[...],
                            preferred_element_type=jnp.float32)

    @pl.when(pl.program_id(2) == pl.num_programs(2) - 1)
    def _():
        o_ref[...] = (acc_ref[...] + b_ref[...]).astype(o_ref.dtype)


def matmul_bias(x, w, b):
    """x:(M,K) w:(K,N) b:(N,). All dims already padded to tileable multiples."""
    M, K = x.shape
    _, N = w.shape
    tm = 256 if M >= 256 else M            # full dim or multiple of 8
    tn = 512 if N >= 512 else N            # full dim or multiple of 128
    tk = 512 if K >= 512 else K
    grid = (M // tm, N // tn, K // tk)
    return pl.pallas_call(
        _matmul_bias_kernel,
        out_shape=jax.ShapeDtypeStruct((M, N), jnp.float32),
        grid_spec=pltpu.PrefetchScalarGridSpec(
            num_scalar_prefetch=0,
            grid=grid,
            in_specs=[
                pl.BlockSpec((tm, tk), lambda i, j, k: (i, k)),
                pl.BlockSpec((tk, tn), lambda i, j, k: (k, j)),
                pl.BlockSpec((1, tn), lambda i, j, k: (0, j)),
            ],
            out_specs=pl.BlockSpec((tm, tn), lambda i, j, k: (i, j)),
            scratch_shapes=[pltpu.VMEM((tm, tn), jnp.float32)],
        ),
        compiler_params=pltpu.CompilerParams(
            dimension_semantics=("parallel", "parallel", "arbitrary")),
    )(x, w, b[None, :])


# ---------------------------------------------------------------------------
# kernel 2: LSTM recurrence (input projection already folded into gx)
# ---------------------------------------------------------------------------
def lstm_recurrence_kernel(gx_ref, w_hh_ref, h_out_ref, h_scr, c_scr):
    """Single grid step; whole sequence resident in VMEM; time via fori_loop."""
    hdim = h_scr.shape[-1]          # padded hidden, multiple of 128
    seq = gx_ref.shape[0]

    h_scr[...] = jnp.zeros_like(h_scr)
    c_scr[...] = jnp.zeros_like(c_scr)

    def step(t, carry):
        h = h_scr[...]
        c = c_scr[...]
        # gates = (x_t @ W_ih^T + b)  [precomputed]  +  h @ W_hh^T
        gates = gx_ref[t] + jnp.dot(h, w_hh_ref[...],
                                    preferred_element_type=jnp.float32)
        # PyTorch gate order i, f, g, o; each slice is a 128-lane-aligned chunk.
        i_g = jax.nn.sigmoid(gates[:, 0 * hdim:1 * hdim])
        f_g = jax.nn.sigmoid(gates[:, 1 * hdim:2 * hdim])
        g_g = jnp.tanh(gates[:, 2 * hdim:3 * hdim])
        o_g = jax.nn.sigmoid(gates[:, 3 * hdim:4 * hdim])
        c_new = f_g * c + i_g * g_g
        h_new = o_g * jnp.tanh(c_new)
        c_scr[...] = c_new
        h_scr[...] = h_new
        h_out_ref[t] = h_new
        return carry

    jax.lax.fori_loop(0, seq, step, 0, unroll=True)


# ---------------------------------------------------------------------------
# full forward
# ---------------------------------------------------------------------------
def decoder_forward(params, features, captions):
    """DecoderRNN.forward: features (B, E) float32, captions (B, T) int32."""
    # glue: embedding lookup + concat (== torch.cat((features.unsqueeze(1), emb), 1))
    emb = params["embed_w"][captions[:, :-1]]                  # (B, T-1, E)
    x = jnp.concatenate([features[:, None, :], emb], axis=1)   # (B, T, E)
    x = x.astype(jnp.float32)

    S, N, E = x.shape        # batch_first=False: time = B, LSTM batch = T
    H = params["w_hh"].shape[1]
    V = params["lin_w"].shape[0]

    # padded sizes (lane-dense, vreg-aligned)
    Hp = _round_up(H, 128)
    Ep = _pad_lanes(E)
    Vp = _pad_lanes(V)
    Np = _round_up(N, 8)
    M = S * Np
    Mp = _pad_rows(M)

    # --- weight prep: re-layout gate dim so each gate occupies its own
    # 128-aligned chunk of the padded 4*Hp axis, and pre-transpose.
    w_ih = params["w_ih"].reshape(4, H, E)
    w_hh = params["w_hh"].reshape(4, H, H)
    bias = (params["b_ih"] + params["b_hh"]).reshape(4, H)

    w_ih_p = jnp.zeros((4, Hp, Ep), jnp.float32).at[:, :H, :E].set(w_ih)
    w_hh_p = jnp.zeros((4, Hp, Hp), jnp.float32).at[:, :H, :H].set(w_hh)
    b_p = jnp.zeros((4, Hp), jnp.float32).at[:, :H].set(bias)

    w_ih_t = w_ih_p.reshape(4 * Hp, Ep).T          # (Ep, 4*Hp)
    w_hh_t = w_hh_p.reshape(4 * Hp, Hp).T          # (Hp, 4*Hp)
    b_gates = b_p.reshape(4 * Hp)                  # (4*Hp,)

    w_out_t = jnp.zeros((Hp, Vp), jnp.float32).at[:H, :V].set(params["lin_w"].T)
    b_out = jnp.zeros((Vp,), jnp.float32).at[:V].set(params["lin_b"])

    # --- stage 1: batched input projection over ALL timesteps (MXU-friendly M)
    x_p = jnp.zeros((S, Np, Ep), jnp.float32).at[:, :N, :E].set(x)
    x_flat = jnp.pad(x_p.reshape(M, Ep), ((0, Mp - M), (0, 0)))
    gx = matmul_bias(x_flat, w_ih_t, b_gates)[:M].reshape(S, Np, 4 * Hp)

    # --- stage 2: serial LSTM recurrence, single grid step, state in VMEM
    # TODO(synk): for long sequences / large Hp, tile the sequence over a grid
    # axis instead of holding all of gx/h_out resident in VMEM.
    h_all = pl.pallas_call(
        lstm_recurrence_kernel,
        out_shape=jax.ShapeDtypeStruct((S, Np, Hp), jnp.float32),
        grid_spec=pltpu.PrefetchScalarGridSpec(
            num_scalar_prefetch=0,
            grid=(1,),
            in_specs=[
                pl.BlockSpec((S, Np, 4 * Hp), lambda i: (0, 0, 0)),
                pl.BlockSpec((Hp, 4 * Hp), lambda i: (0, 0)),
            ],
            out_specs=pl.BlockSpec((S, Np, Hp), lambda i: (0, 0, 0)),
            scratch_shapes=[
                pltpu.VMEM((Np, Hp), jnp.float32),   # h state
                pltpu.VMEM((Np, Hp), jnp.float32),   # c state
            ],
        ),
        compiler_params=pltpu.CompilerParams(
            dimension_semantics=("arbitrary",)),     # recurrence is serial
    )(gx, w_hh_t)

    # --- stage 3: batched vocab projection (dominant FLOP, fully parallel)
    h_flat = jnp.pad(h_all.reshape(M, Hp), ((0, Mp - M), (0, 0)))
    logits = matmul_bias(h_flat, w_out_t, b_out)[:M].reshape(S, Np, Vp)

    return logits[:, :N, :V]                        # (B, T, vocab)


# ---------------------------------------------------------------------------
# pure-JAX reference (matches PyTorch nn.LSTM semantics)
# ---------------------------------------------------------------------------
def decoder_forward_ref(params, features, captions):
    emb = params["embed_w"][captions[:, :-1]]
    x = jnp.concatenate([features[:, None, :], emb], axis=1).astype(jnp.float32)
    hdim = params["w_hh"].shape[1]
    n = x.shape[1]

    def step(carry, x_t):
        h, c = carry
        gates = (x_t @ params["w_ih"].T + params["b_ih"]
                 + h @ params["w_hh"].T + params["b_hh"])
        i_g = jax.nn.sigmoid(gates[:, 0 * hdim:1 * hdim])
        f_g = jax.nn.sigmoid(gates[:, 1 * hdim:2 * hdim])
        g_g = jnp.tanh(gates[:, 2 * hdim:3 * hdim])
        o_g = jax.nn.sigmoid(gates[:, 3 * hdim:4 * hdim])
        c_new = f_g * c + i_g * g_g
        h_new = o_g * jnp.tanh(c_new)
        return (h_new, c_new), h_new

    h0 = jnp.zeros((n, hdim), jnp.float32)
    c0 = jnp.zeros((n, hdim), jnp.float32)
    _, hs = jax.lax.scan(step, (h0, c0), x)
    return hs @ params["lin_w"].T + params["lin_b"]


def init_params(key, embed_size, hidden_size, vocab_size):
    ks = jax.random.split(key, 7)
    s = 0.1
    return {
        "embed_w": s * jax.random.normal(ks[0], (vocab_size, embed_size), jnp.float32),
        "w_ih": s * jax.random.normal(ks[1], (4 * hidden_size, embed_size), jnp.float32),
        "w_hh": s * jax.random.normal(ks[2], (4 * hidden_size, hidden_size), jnp.float32),
        "b_ih": s * jax.random.normal(ks[3], (4 * hidden_size,), jnp.float32),
        "b_hh": s * jax.random.normal(ks[4], (4 * hidden_size,), jnp.float32),
        "lin_w": s * jax.random.normal(ks[5], (vocab_size, hidden_size), jnp.float32),
        "lin_b": s * jax.random.normal(ks[6], (vocab_size,), jnp.float32),
    }


if __name__ == "__main__":
    embed_size, hidden_size, vocab_size = 16, 32, 48
    batch, cap_len = 2, 8                      # -> seq (time) = batch = 2, LSTM batch = 8

    key = jax.random.PRNGKey(0)
    k_par, k_feat, k_cap = jax.random.split(key, 3)

    params = init_params(k_par, embed_size, hidden_size, vocab_size)
    features = jax.random.normal(k_feat, (batch, embed_size), jnp.float32)
    captions = jax.random.randint(k_cap, (batch, cap_len), 0, vocab_size, jnp.int32)

    out = decoder_forward(params, features, captions)
    out = jax.block_until_ready(out)

    ref = decoder_forward_ref(params, features, captions)
    assert out.shape == (batch, cap_len, vocab_size)
    assert jnp.allclose(out, ref, atol=1e-4, rtol=1e-4), "mismatch vs reference"

    print("KERNEL_OK")
</pallas_src>

<mosaic_0001>
module attributes {stable_mosaic.version = 11 : i64} {
  func.func @_matmul_bias_kernel(%arg0: i32, %arg1: i32, %arg2: i32, %arg3: memref<16x128xf32, #tpu.memory_space<vmem>>, %arg4: memref<128x512xf32, #tpu.memory_space<vmem>>, %arg5: memref<1x512xf32, #tpu.memory_space<vmem>>, %arg6: memref<16x512xf32, #tpu.memory_space<vmem>>, %arg7: memref<16x512xf32, #tpu.memory_space<vmem>>) attributes {dimension_semantics = [#tpu.dimension_semantics<parallel>, #tpu.dimension_semantics<parallel>, #tpu.dimension_semantics<arbitrary>], iteration_bounds = array<i64: 1, 1, 1>, scalar_prefetch = 0 : i64, scratch_operands = 1 : i64, tpu.core_type = #tpu.core_type<tc>, window_params = [{transform_indices = @transform_0, window_bounds = array<i64: 16, 128>}, {transform_indices = @transform_1, window_bounds = array<i64: 128, 512>}, {transform_indices = @transform_2, window_bounds = array<i64: 1, 512>}, {transform_indices = @transform_3, window_bounds = array<i64: 16, 512>}]} {
    %c0_i32 = arith.constant 0 : i32
    %0 = arith.cmpi eq, %arg2, %c0_i32 : i32
    %1 = arith.extui %0 : i1 to i32
    %c0_i32_0 = arith.constant 0 : i32
    %2 = arith.cmpi ne, %1, %c0_i32_0 : i32
    scf.if %2 {
      %cst_10 = arith.constant 0.000000e+00 : f32
      %12 = vector.broadcast %cst_10 : f32 to vector<16x512xf32>
      %c0_11 = arith.constant 0 : index
      %c0_12 = arith.constant 0 : index
      %13 = vector.load %arg7[%c0_11, %c0_12] : memref<16x512xf32, #tpu.memory_space<vmem>>, vector<16x512xf32>
      tpu.vector_store %arg7[%c0_11, %c0_12], %12 {strides = array<i32>} : memref<16x512xf32, #tpu.memory_space<vmem>>, vector<16x512xf32>,
    } else {
    }
    %c0 = arith.constant 0 : index
    %c0_1 = arith.constant 0 : index
    %3 = vector.load %arg7[%c0, %c0_1] : memref<16x512xf32, #tpu.memory_space<vmem>>, vector<16x512xf32>
    %c0_2 = arith.constant 0 : index
    %c0_3 = arith.constant 0 : index
    %4 = vector.load %arg3[%c0_2, %c0_3] : memref<16x128xf32, #tpu.memory_space<vmem>>, vector<16x128xf32>
    %c0_4 = arith.constant 0 : index
    %c0_5 = arith.constant 0 : index
    %5 = vector.load %arg4[%c0_4, %c0_5] : memref<128x512xf32, #tpu.memory_space<vmem>>, vector<128x512xf32>
    %cst = arith.constant dense<0.000000e+00> : vector<16x512xf32>
    %6 = tpu.matmul %4, %5, %cst {dimension_numbers = #tpu.dot_dimension_numbers<[1], [0], [0], [1], [0, 0, 1, 1], [], []>} : vector<16x128xf32>, vector<128x512xf32>, vector<16x512xf32> -> vector<16x512xf32>
    %7 = arith.addf %3, %6 : vector<16x512xf32>
    %c0_6 = arith.constant 0 : index
    %c0_7 = arith.constant 0 : index
    %8 = vector.load %arg7[%c0_6, %c0_7] : memref<16x512xf32, #tpu.memory_space<vmem>>, vector<16x512xf32>
    tpu.vector_store %arg7[%c0_6, %c0_7], %7 {strides = array<i32>} : memref<16x512xf32, #tpu.memory_space<vmem>>, vector<16x512xf32>,
    %c0_i32_8 = arith.constant 0 : i32
    %9 = arith.cmpi eq, %arg2, %c0_i32_8 : i32
    %10 = arith.extui %9 : i1 to i32
    %c0_i32_9 = arith.constant 0 : i32
    %11 = arith.cmpi ne, %10, %c0_i32_9 : i32
    scf.if %11 {
      %c0_10 = arith.constant 0 : index
      %c0_11 = arith.constant 0 : index
      %12 = vector.load %arg7[%c0_10, %c0_11] : memref<16x512xf32, #tpu.memory_space<vmem>>, vector<16x512xf32>
      %c0_12 = arith.constant 0 : index
      %c0_13 = arith.constant 0 : index
      %13 = vector.load %arg5[%c0_12, %c0_13] : memref<1x512xf32, #tpu.memory_space<vmem>>, vector<1x512xf32>
      %14 = vector.broadcast %13 : vector<1x512xf32> to vector<16x512xf32>
      %15 = arith.addf %12, %14 : vector<16x512xf32>
      %c0_14 = arith.constant 0 : index
      %c0_15 = arith.constant 0 : index
      %16 = vector.load %arg6[%c0_14, %c0_15] : memref<16x512xf32, #tpu.memory_space<vmem>>, vector<16x512xf32>
      tpu.vector_store %arg6[%c0_14, %c0_15], %15 {strides = array<i32>} : memref<16x512xf32, #tpu.memory_space<vmem>>, vector<16x512xf32>,
    } else {
    }
    return
  }
  func.func @transform_0(%arg0: i32, %arg1: i32, %arg2: i32) -> (i32, i32) {
    %c0_i32 = arith.constant 0 : i32
    return %arg0, %arg2 : i32, i32
  }
  func.func @transform_1(%arg0: i32, %arg1: i32, %arg2: i32) -> (i32, i32) {
    %c0_i32 = arith.constant 0 : i32
    return %arg2, %arg1 : i32, i32
  }
  func.func @transform_2(%arg0: i32, %arg1: i32, %arg2: i32) -> (i32, i32) {
    %c0_i32 = arith.constant 0 : i32
    %c0_i32_0 = arith.constant 0 : i32
    return %c0_i32, %arg1 : i32, i32
  }
  func.func @transform_3(%arg0: i32, %arg1: i32, %arg2: i32) -> (i32, i32) {
    %c0_i32 = arith.constant 0 : i32
    return %arg0, %arg1 : i32, i32
  }
}

</mosaic_0001>

<bundles_post_ra>
// kernel: tpu_custom_call.1
= control target key start
LH: loop header
LB: loop body
LE: loop exit
PB: predicated region body
PF: predicated region fallthrough
CT: control target
= control target key end

     0   :  { %8 = vsyncpa [#allocation4], 0  ;;  %s587_s0 = inlined_call_operand.hbm [shape: f32[16,128], index: 0, kind: input, shape index: {}]   ;;  %s588_s1 = inlined_call_operand.hbm [shape: f32[128,512], index: 1, kind: input, shape index: {}]   ;;  %s589_s2 = inlined_call_operand.vmem [shape: f32[1,512], index: 2, kind: input, shape index: {}]   ;;  %s590_s3 = inlined_call_operand.hbm [shape: f32[16,512], index: 3, kind: output, shape index: {}]  }
   0x1   :  { %9 = vsyncpa [#allocation7], 0 }
   0x2   :  { %10 = vsyncpa [#allocation5], 0  ;;  %s510_s12 = smov [#allocation3]   ;;  %s438_s16 = scalar_lea.hbm %s587_s0, 256 }
   0x3   :  { %s16_s13 = sshll.u32 %s510_s12, 4  ;;  %p439_p0 = scmp.ne.s32.totalorder %s587_s0, %s438_s16  ;;  %s17_s13 = int_to_ptr.vmem [resolvable:$true] %s16_s13 }
   0x4   :  { %p442_p1 = scmp.lt.u32.totalorder %s438_s16, %s587_s0 }
   0x6   :  { %p444_p2 = pnand %p442_p1, %p439_p0 }
   0x8   :  { %447 = shalt.err (!%p444_p2)
}
   0x9   :  { %s448_s21 = scalar_lea.vmem %s17_s13, 256  ;;  %p453_p4 = scmp.lt.s32.totalorder %s17_s13, %s17_s13 }
   0xa   :  { %p449_p3 = scmp.ne.s32.totalorder %s17_s13, %s448_s21  ;;  %p454_p5 = scmp.lt.s32.totalorder %s448_s21, %s448_s21 }
   0xc   :  { %p455_p6 = por %p454_p5, %p453_p4 }
   0xe   :  { %p456_p7 = pnand %p455_p6, %p449_p3 }
  0x10   :  { %459 = shalt.err (!%p456_p7)
}
  0x11   :  { %s511_s22 = smov 128   ;;  %s512_s23 = smov 8  }
  0x12   :  { %22 = dma.hbm_to_vmem [thread:$0]  %s587_s0, 256, %s17_s13, [#allocation4], %s511_s22, %s511_s22, %s512_s23  }
  0x13   :  { %s513_s26 = smov [#allocation6]   ;;  %s460_s30 = scalar_lea.hbm %s588_s1, 8192 }
  0x14   :  { %s28_s27 = sshll.u32 %s513_s26, 4  ;;  %p461_p8 = scmp.ne.s32.totalorder %s588_s1, %s460_s30  ;;  %s29_s27 = int_to_ptr.vmem [resolvable:$true] %s28_s27 }
  0x15   :  { %p464_p9 = scmp.lt.u32.totalorder %s460_s30, %s588_s1 }
  0x17   :  { %p466_p10 = pnand %p464_p9, %p461_p8 }
  0x19   :  { %469 = shalt.err (!%p466_p10)
}
  0x1a   :  { %s470_s8 = scalar_lea.vmem %s29_s27, 8192  ;;  %p475_p12 = scmp.lt.s32.totalorder %s29_s27, %s29_s27 }
  0x1b   :  { %p471_p11 = scmp.ne.s32.totalorder %s29_s27, %s470_s8  ;;  %p476_p13 = scmp.lt.s32.totalorder %s470_s8, %s470_s8 }
  0x1d   :  { %p477_p0 = por %p476_p13, %p475_p12 }
  0x1f   :  { %p478_p1 = pnand %p477_p0, %p471_p11 }
  0x21   :  { %481 = shalt.err (!%p478_p1)
}
  0x22   :  { %s514_s0 = smov 512   ;;  %s515_s9 = smov 32  }
  0x23   :  { %34 = dma.hbm_to_vmem [thread:$0]  %s588_s1, 8192, %s29_s27, [#allocation7], %s514_s0, %s514_s0, %s515_s9  }
  0x24   :  { %504 = dma.done.wait [#allocation4], 256  }
  0x25   :  { %505 = vsyncadd [#allocation4], 4294967040 }
  0x26   :  { %506 = dma.done.wait [#allocation7], 8192  }
  0x27   :  { %507 = vsyncadd [#allocation7], 4294959104  ;;  %v516_v0 = vmov 0.0   ;;  %v66_v1 = vld [vmem:[#allocation6 + $0x8] sm:$0xff]  ;;  %v68_v3 = vld [vmem:[#allocation6 + $0x18] sm:$0xff] }
  0x28   :  { %193 = vmatprep.mubr.f32.mxu0 %v516_v0  ;;  %270 = vmatprep.mubr.f32.mxu1 %v516_v0  ;;  %v70_v2 = vld [vmem:[#allocation6 + $0x28] sm:$0xff]  ;;  %v72_v5 = vld [vmem:[#allocation6 + $0x38] sm:$0xff]  ;;  %v65_v6 = vld [vmem:[#allocation6] sm:$0xff] }
  0x29   :  { %v366_v4 = vpack.c.bf16 %v70_v2, %v66_v1  ;;  %v69_v7 = vld [vmem:[#allocation6 + $0x20] sm:$0xff]  ;;  %v398_v8 = vpack.c.bf16 %v72_v5, %v68_v3  ;;  %v67_v10 = vld [vmem:[#allocation6 + $0x10] sm:$0xff]  ;;  %v74_v12 = vld [vmem:[#allocation6 + $0x48] sm:$0xff] }
  0x2a   :  { %v368_v9 = vpack.c.bf16 %v69_v7, %v65_v6  ;;  %v71_v11 = vld [vmem:[#allocation6 + $0x30] sm:$0xff]  ;;  %v78_v14 = vld [vmem:[#allocation6 + $0x68] sm:$0xff]  ;;  %v76_v15 = vld [vmem:[#allocation6 + $0x58] sm:$0xff] }
  0x2b   :  { %367 = vmatprep.subr.bf16.mxu0 %v366_v4  ;;  %v400_v13 = vpack.c.bf16 %v71_v11, %v67_v10  ;;  %v80_v16 = vld [vmem:[#allocation6 + $0x78] sm:$0xff]  ;;  %399 = vmatprep.subr.bf16.mxu1 %v398_v8  ;;  %v370_v17 = vpack.c.bf16 %v78_v14, %v74_v12  ;;  %v73_v19 = vld [vmem:[#allocation6 + $0x40] sm:$0xff]  ;;  %v75_v21 = vld [vmem:[#allocation6 + $0x50] sm:$0xff] }
  0x2c   :  { %369 = vmatpush1.bf16.msra.mxu0 %v368_v9  ;;  %v402_v18 = vpack.c.bf16 %v80_v16, %v76_v15  ;;  %v77_v20 = vld [vmem:[#allocation6 + $0x60] sm:$0xff]  ;;  %v79_v23 = vld [vmem:[#allocation6 + $0x70] sm:$0xff]  ;;  %v82_v24 = vld [vmem:[#allocation6 + $0x88] sm:$0xff] }
  0x2d   :  { %401 = vmatpush1.bf16.msra.mxu1 %v400_v13  ;;  %v372_v22 = vpack.c.bf16 %v77_v20, %v73_v19  ;;  %v86_v25 = vld [vmem:[#allocation6 + $0xa8] sm:$0xff]  ;;  %371 = vmatprep.subr.bf16.mxu0 %v370_v17  ;;  %v404_v26 = vpack.c.bf16 %v79_v23, %v75_v21  ;;  %v84_v28 = vld [vmem:[#allocation6 + $0x98] sm:$0xff]  ;;  %v81_v30 = vld [vmem:[#allocation6 + $0x80] sm:$0xff] }
  0x2e   :  { %403 = vmatprep.subr.bf16.mxu1 %v402_v18  ;;  %v374_v27 = vpack.c.bf16 %v86_v25, %v82_v24  ;;  %v88_v29 = vld [vmem:[#allocation6 + $0xb8] sm:$0xff]  ;;  %v85_v32 = vld [vmem:[#allocation6 + $0xa0] sm:$0xff]  ;;  %v83_v33 = vld [vmem:[#allocation6 + $0x90] sm:$0xff] }
  0x2f   :  { %v406_v31 = vpack.c.bf16 %v88_v29, %v84_v28  ;;  %v87_v34 = vld [vmem:[#allocation6 + $0xb0] sm:$0xff]  ;;  %v376_v35 = vpack.c.bf16 %v85_v32, %v81_v30  ;;  %v90_v36 = vld [vmem:[#allocation6 + $0xc8] sm:$0xff]  ;;  %v92_v38 = vld [vmem:[#allocation6 + $0xd8] sm:$0xff] }
  0x30   :  { %373 = vmatpush1.bf16.msra.mxu0 %v372_v22  ;;  %v94_v37 = vld [vmem:[#allocation6 + $0xe8] sm:$0xff]  ;;  %v408_v39 = vpack.c.bf16 %v87_v34, %v83_v33  ;;  %v96_v41 = vld [vmem:[#allocation6 + $0xf8] sm:$0xff]  ;;  %v89_v42 = vld [vmem:[#allocation6 + $0xc0] sm:$0xff] }
  0x31   :  { %405 = vmatpush1.bf16.msra.mxu1 %v404_v26  ;;  %375 = vmatprep.subr.bf16.mxu0 %v374_v27  ;;  %v378_v40 = vpack.c.bf16 %v94_v37, %v90_v36  ;;  %v93_v43 = vld [vmem:[#allocation6 + $0xe0] sm:$0xff]  ;;  %v410_v44 = vpack.c.bf16 %v96_v41, %v92_v38  ;;  %v91_v45 = vld [vmem:[#allocation6 + $0xd0] sm:$0xff]  ;;  %v98_v47 = vld [vmem:[#allocation6 + $0x108] sm:$0xff]  ;;  %v312_v36 = vlaneseq }
  0x32   :  { %407 = vmatprep.subr.bf16.mxu1 %v406_v31  ;;  %v95_v46 = vld [vmem:[#allocation6 + $0xf0] sm:$0xff]  ;;  %v102_v48 = vld [vmem:[#allocation6 + $0x128] sm:$0xff]  ;;  %v100_v49 = vld [vmem:[#allocation6 + $0x118] sm:$0xff]  ;;  %v380_v51 = vpack.c.bf16 %v93_v43, %v89_v42 }
  0x33   :  { %v104_v50 = vld [vmem:[#allocation6 + $0x138] sm:$0xff]  ;;  %v412_v52 = vpack.c.bf16 %v95_v46, %v91_v45  ;;  %v382_v53 = vpack.c.bf16 %v102_v48, %v98_v47  ;;  %v97_v54 = vld [vmem:[#allocation6 + $0x100] sm:$0xff]  ;;  %v99_v56 = vld [vmem:[#allocation6 + $0x110] sm:$0xff]  ;;  %v313_v37 = vshrl.u32 %v312_v36, 7 }
  0x34   :  { %377 = vmatpush1.bf16.msra.mxu0 %v376_v35  ;;  %v101_v55 = vld [vmem:[#allocation6 + $0x120] sm:$0xff]  ;;  %v414_v57 = vpack.c.bf16 %v104_v50, %v100_v49  ;;  %v103_v58 = vld [vmem:[#allocation6 + $0x130] sm:$0xff]  ;;  %v106_v59 = vld [vmem:[#allocation6 + $0x148] sm:$0xff] }
  0x35   :  { %409 = vmatpush1.bf16.msra.mxu1 %v408_v39  ;;  %379 = vmatprep.subr.bf16.mxu0 %v378_v40  ;;  %v110_v60 = vld [vmem:[#allocation6 + $0x168] sm:$0xff]  ;;  %v108_v61 = vld [vmem:[#allocation6 + $0x158] sm:$0xff]  ;;  %v384_v63 = vpack.c.bf16 %v101_v55, %v97_v54  ;;  %v416_v1 = vpack.c.bf16 %v103_v58, %v99_v56  ;;  %v105_v3 = vld [vmem:[#allocation6 + $0x140] sm:$0xff]  ;;  %v314_v38 = vsub.s32 0, %v313_v37  ;;  %v322_v40 = vsub.s32 2, %v313_v37 }
  0x36   :  { %411 = vmatprep.subr.bf16.mxu1 %v410_v44  ;;  %v112_v62 = vld [vmem:[#allocation6 + $0x178] sm:$0xff]  ;;  %v386_v2 = vpack.c.bf16 %v110_v60, %v106_v59  ;;  %v109_v4 = vld [vmem:[#allocation6 + $0x160] sm:$0xff]  ;;  %v107_v5 = vld [vmem:[#allocation6 + $0x150] sm:$0xff]  ;;  %v318_v41 = vsub.s32 1, %v313_v37  ;;  %v326_v42 = vsub.s32 3, %v313_v37 }
  0x37   :  { %v418_v6 = vpack.c.bf16 %v112_v62, %v108_v61  ;;  %v111_v7 = vld [vmem:[#allocation6 + $0x170] sm:$0xff]  ;;  %v114_v8 = vld [vmem:[#allocation6 + $0x188] sm:$0xff]  ;;  %v116_v10 = vld [vmem:[#allocation6 + $0x198] sm:$0xff]  ;;  %v388_v12 = vpack.c.bf16 %v109_v4, %v105_v3 }
  0x38   :  { %381 = vmatpush1.bf16.msra.mxu0 %v380_v51  ;;  %v118_v9 = vld [vmem:[#allocation6 + $0x1a8] sm:$0xff]  ;;  %v120_v11 = vld [vmem:[#allocation6 + $0x1b8] sm:$0xff]  ;;  %v420_v13 = vpack.c.bf16 %v111_v7, %v107_v5  ;;  %v113_v15 = vld [vmem:[#allocation6 + $0x180] sm:$0xff] }
  0x39   :  { %413 = vmatpush1.bf16.msra.mxu1 %v412_v52  ;;  %383 = vmatprep.subr.bf16.mxu0 %v382_v53  ;;  %v390_v14 = vpack.c.bf16 %v118_v9, %v114_v8  ;;  %v117_v16 = vld [vmem:[#allocation6 + $0x1a0] sm:$0xff]  ;;  %v115_v17 = vld [vmem:[#allocation6 + $0x190] sm:$0xff]  ;;  %v422_v18 = vpack.c.bf16 %v120_v11, %v116_v10  ;;  %v122_v20 = vld [vmem:[#allocation6 + $0x1c8] sm:$0xff] }
  0x3a   :  { %415 = vmatprep.subr.bf16.mxu1 %v414_v57  ;;  %v119_v19 = vld [vmem:[#allocation6 + $0x1b0] sm:$0xff]  ;;  %v126_v21 = vld [vmem:[#allocation6 + $0x1e8] sm:$0xff]  ;;  %v124_v22 = vld [vmem:[#allocation6 + $0x1d8] sm:$0xff]  ;;  %v392_v24 = vpack.c.bf16 %v117_v16, %v113_v15 }
  0x3b   :  { %v128_v23 = vld [vmem:[#allocation6 + $0x1f8] sm:$0xff]  ;;  %v424_v25 = vpack.c.bf16 %v119_v19, %v115_v17  ;;  %v394_v26 = vpack.c.bf16 %v126_v21, %v122_v20  ;;  %v121_v27 = vld [vmem:[#allocation6 + $0x1c0] sm:$0xff]  ;;  %v123_v30 = vld [vmem:[#allocation6 + $0x1d0] sm:$0xff] }
  0x3c   :  { %385 = vmatpush1.bf16.msra.mxu0 %v384_v63  ;;  %v125_v28 = vld [vmem:[#allocation6 + $0x1e0] sm:$0xff]  ;;  %v426_v29 = vpack.c.bf16 %v128_v23, %v124_v22  ;;  %v127_v31 = vld [vmem:[#allocation6 + $0x1f0] sm:$0xff]  ;;  %v64_v35 = vld [vmem:[#allocation3 + $0x8] sm:$0xff] }
  0x3d   :  { %417 = vmatpush1.bf16.msra.mxu1 %v416_v1  ;;  %387 = vmatprep.subr.bf16.mxu0 %v386_v2  ;;  %v396_v32 = vpack.c.bf16 %v125_v28, %v121_v27  ;;  %v428_v33 = vpack.c.bf16 %v127_v31, %v123_v30  ;;  %v63_v34 = vld [vmem:[#allocation3] sm:$0xff] }
  0x3e   :  { %419 = vmatprep.subr.bf16.mxu1 %v418_v6  ;;  %v310_v39 = vld [vmem:[%s589_s2] sm:$0xf]  ;;  %s517_s2 = smov [#allocation8]  }
  0x3f   :  { %v315_v43 = vrot.slane %v310_v39, %v314_v38  ;;  %v323_v44 = vrot.slane %v310_v39, %v322_v40  ;;  %v319_v45 = vrot.slane %v310_v39, %v318_v41  ;;  %v327_v46 = vrot.slane %v310_v39, %v326_v42  ;;  %s353_s13 = sshll.u32 %s517_s2, 4  ;;  %s354_s13 = int_to_ptr.vmem [resolvable:$true] %s353_s13 }
  0x40   :  { %389 = vmatpush1.bf16.msra.mxu0 %v388_v12  ;;  %s482_s14 = scalar_lea.vmem %s354_s13, 1024  ;;  %p487_p3 = scmp.lt.s32.totalorder %s354_s13, %s354_s13 }
  0x41   :  { %421 = vmatpush1.bf16.msra.mxu1 %v420_v13  ;;  %391 = vmatprep.subr.bf16.mxu0 %v390_v14  ;;  %p483_p2 = scmp.ne.s32.totalorder %s354_s13, %s482_s14  ;;  %p488_p4 = scmp.lt.s32.totalorder %s482_s14, %s482_s14 }
  0x42   :  { %423 = vmatprep.subr.bf16.mxu1 %v422_v18 }
  0x43   :  { %p489_p5 = por %p488_p4, %p487_p3 }
  0x44   :  { %393 = vmatpush1.bf16.msra.mxu0 %v392_v24 }
  0x45   :  { %425 = vmatpush1.bf16.msra.mxu1 %v424_v25  ;;  %395 = vmatprep.subr.bf16.mxu0 %v394_v26  ;;  %p490_p6 = pnand %p489_p5, %p483_p2 }
  0x46   :  { %427 = vmatprep.subr.bf16.mxu1 %v426_v29 }
  0x48   :  { %397 = vmatpush1.bf16.msra.mxu0 %v396_v32 }
  0x49   :  { %429 = vmatpush1.bf16.msra.mxu1 %v428_v33 }
  0x4b   :  { %194 = vmatmul.mubr.f32.vlgmr.msra.gmra.mrb[0].mxu0 %v63_v34 }
  0x4c   :  { %271 = vmatmul.mubr.f32.vlgmr.msra.gmra.mrb[0].mxu1 %v63_v34  ;;  %199 = vmatprep.mubr.f32.mxu0 %v516_v0 }
  0x4d   :  { %276 = vmatprep.mubr.f32.mxu1 %v516_v0 }
  0x4f   :  { %200 = vmatmul.mubr.f32.gmra.mrb[2].mxu0 %v64_v35 }
  0x50   :  { %277 = vmatmul.mubr.f32.gmra.mrb[2].mxu1 %v64_v35 }
 0x11e   :  { %v195_v47 = vpop.f32.mrb[0].mxu0 }
 0x11f   :  { %v332_v48 = vadd.f32 %v315_v43, %v195_v47  ;;  %v272_v49 = vpop.f32.mrb[0].mxu1  ;;  %v197_v0 = vpop.f32.mrb[1].mxu0 }
 0x120   :  { %v334_v50 = vadd.f32 %v323_v44, %v272_v49  ;;  %v333_v51 = vadd.f32 %v319_v45, %v197_v0  ;;  %v274_v52 = vpop.f32.mrb[1].mxu1 }
 0x121   :  { %340 = vst [vmem:[#allocation8] sm:$0xff] %v332_v48  ;;  %v335_v53 = vadd.f32 %v327_v46, %v274_v52 }
 0x122   :  { %342 = vst [vmem:[#allocation8 + $0x10] sm:$0xff] %v334_v50  ;;  %341 = vst [vmem:[#allocation8 + $0x8] sm:$0xff] %v333_v51  ;;  %v201_v54 = vpop.f32.mrb[2].mxu0 }
 0x123   :  { %343 = vst [vmem:[#allocation8 + $0x18] sm:$0xff] %v335_v53  ;;  %v336_v55 = vadd.f32 %v315_v43, %v201_v54  ;;  %v278_v56 = vpop.f32.mrb[2].mxu1  ;;  %v203_v57 = vpop.f32.mrb[3].mxu0 }
 0x124   :  { %v338_v58 = vadd.f32 %v323_v44, %v278_v56  ;;  %v337_v59 = vadd.f32 %v319_v45, %v203_v57  ;;  %v280_v60 = vpop.f32.mrb[3].mxu1 }
 0x125   :  { %344 = vst [vmem:[#allocation8 + $0x20] sm:$0xff] %v336_v55  ;;  %v339_v61 = vadd.f32 %v327_v46, %v280_v60 }
 0x126   :  { %346 = vst [vmem:[#allocation8 + $0x30] sm:$0xff] %v338_v58  ;;  %345 = vst [vmem:[#allocation8 + $0x28] sm:$0xff] %v337_v59 }
 0x127   :  { %347 = vst [vmem:[#allocation8 + $0x38] sm:$0xff] %v339_v61 }
 0x128   :  { %493 = shalt.err (!%p490_p6)
}
 0x129   :  { %s494_s17 = scalar_lea.hbm %s590_s3, 1024 }
 0x12a   :  { %p495_p7 = scmp.ne.s32.totalorder %s590_s3, %s494_s17  ;;  %p498_p8 = scmp.lt.u32.totalorder %s494_s17, %s590_s3 }
 0x12c   :  { %p500_p9 = pnand %p498_p8, %p495_p7 }
 0x12e   :  { %503 = shalt.err (!%p500_p9)
}
 0x12f   :  { %359 = dma.vmem_to_hbm [thread:$0]  %s354_s13, 1024, %s590_s3, [#allocation5], %s514_s0, %s514_s0, %s515_s9  }
 0x130   :  { %508 = dma.done.wait [#allocation5], 1024  }
 0x131   :  { %509 = vsyncadd [#allocation5], 4294966272 }
 0x132   :  { %363 = vsyncpa [#allocation4], 1 }
 0x133   :  { %364 = vsyncpa [#allocation7], 1 }
 0x134   :  { %365 = vsyncpa [#allocation5], 1 }

</bundles_post_ra>
